<compile_context>
chip_gen: v6e
topology: v6e:2x2x1
jax: 0.10.0
libtpu: 0.0.40
codegen_flags: <defaults>
</compile_context>

<pallas_src>
import functools
import math

import jax
import jax.numpy as jnp
from jax import lax
from jax.experimental import pallas as pl
from jax.experimental.pallas import tpu as pltpu


def _round_up(x, m):
    return ((x + m - 1) // m) * m


def _gpt2_embed_kernel(has_proj, pos_mode, T, RING, S_pad, *refs):
    it = iter(refs)
    ids_ref = next(it)                                    # SMEM (B*S_pad,) int32 token ids
    pos_ids_ref = next(it) if pos_mode == "gather" else None   # SMEM position ids
    word_hbm = next(it)                                   # (V, P) table, HBM (ANY)
    projw_ref = next(it) if has_proj else None            # (P, E) projection weight, VMEM
    pos_in = next(it) if pos_mode != "none" else None     # (T,E) VMEM block  OR  (Mp,E) HBM
    out_ref = next(it)                                    # (T, E) output tile
    emb_sc = next(it)                                     # (T, P) VMEM gather landing buffer
    word_sem = next(it)                                   # DMA semaphores (RING,)
    if pos_mode == "gather":
        pos_sc = next(it)                                 # (T, E) VMEM pos landing buffer
        pos_sem = next(it)                                # DMA semaphores (RING,)

    b = pl.program_id(0)
    st = pl.program_id(1)
    base = b * S_pad + st * T

    def word_copy(row, token, slot):
        return pltpu.make_async_copy(
            word_hbm.at[pl.ds(token, 1), :],
            emb_sc.at[pl.ds(row, 1), :],
            word_sem.at[slot])

    def pos_copy(row, pid, slot):
        return pltpu.make_async_copy(
            pos_in.at[pl.ds(pid, 1), :],
            pos_sc.at[pl.ds(row, 1), :],
            pos_sem.at[slot])

    # Gather the T rows of this tile with up to RING DMAs in flight per table.
    def body(i, carry):
        slot = i % RING

        @pl.when(i >= RING)
        def _wait_prev():
            # Retire the copy that previously used this semaphore slot (it wrote row i-RING).
            word_copy(i - RING, 0, slot).wait()
            if pos_mode == "gather":
                pos_copy(i - RING, 0, slot).wait()

        tok = ids_ref[base + i]
        word_copy(i, tok, slot).start()
        if pos_mode == "gather":
            pid = pos_ids_ref[base + i]
            pos_copy(i, pid, slot).start()
        return carry

    lax.fori_loop(0, T, body, 0)

    # Drain: RING divides T, so slot j's last copy landed on row T - RING + j.
    for j in range(RING):
        word_copy(T - RING + j, 0, j).wait()
        if pos_mode == "gather":
            pos_copy(T - RING + j, 0, j).wait()

    # Finalize: one MXU matmul per tile, f32 accumulation, f32 position add, single cast out.
    if has_proj:
        emb = jnp.dot(emb_sc[...], projw_ref[...], preferred_element_type=jnp.float32)
    else:
        emb = emb_sc[...].astype(jnp.float32)
    if pos_mode == "block":
        emb = emb + pos_in[...].astype(jnp.float32)
    elif pos_mode == "gather":
        emb = emb + pos_sc[...].astype(jnp.float32)
    out_ref[...] = emb.astype(out_ref.dtype)


def gpt2_embeddings(input_ids, word_table, pos_table=None, proj_weight=None,
                    position_ids=None, row_tile=256, dma_ring=8,
                    compute_dtype=None, vmem_limit_bytes=None):
    """Pallas port of GPT2Embeddings.forward.

    input_ids:     (B, S) int
    word_table:    (V, P)         nn.Embedding(vocab_size, word_embed_proj_dim or embed_dim)
    pos_table:     (max_pos, E) or None (max_position_embeddings == 0)
    proj_weight:   (E, P) or None        nn.Linear(word_embed_proj_dim, embed_dim, bias=False)
    position_ids:  (B, S) / (S,) int or None (defaults to arange(S) per batch row)
    compute_dtype: optional dtype to cast tables/weight to before the kernel (e.g. bf16)
    returns:       (B, S, E) in word_table's original dtype
    """
    assert input_ids.ndim == 2
    B, S = input_ids.shape
    V, P = word_table.shape
    has_proj = proj_weight is not None
    has_pos = pos_table is not None and pos_table.shape[0] > 0
    E = proj_weight.shape[0] if has_proj else P
    if has_proj:
        assert proj_weight.shape == (E, P)
    if has_pos:
        assert pos_table.shape[1] == E

    out_dtype = word_table.dtype
    if compute_dtype is not None:
        word_table = word_table.astype(compute_dtype)
        if has_proj:
            proj_weight = proj_weight.astype(compute_dtype)
        if has_pos:
            pos_table = pos_table.astype(compute_dtype)

    # Row tile: multiple of 8, at most row_tile, covering the (padded) sequence.
    T = min(row_tile, _round_up(S, 8))
    T = max(8, (T // 8) * 8)
    S_pad = _round_up(S, T)
    num_s_tiles = S_pad // T
    RING = max(1, math.gcd(T, max(1, dma_ring)))     # RING | T (needed by the drain loop)

    # Clamp ids (torch would raise on OOB; padding_idx only affects gradients).
    ids = jnp.clip(input_ids.astype(jnp.int32), 0, V - 1)
    ids_flat = jnp.pad(ids, ((0, 0), (0, S_pad - S))).reshape(-1)

    scalar_args = [ids_flat]
    tensor_args = [word_table]
    in_specs = [pl.BlockSpec(memory_space=pl.ANY)]    # (V, P) stays in HBM, gathered manually

    if has_proj:
        projw = jnp.transpose(proj_weight)            # (P, E)
        tensor_args.append(projw)
        in_specs.append(pl.BlockSpec((P, E), lambda b, st, *_: (0, 0)))

    pos_mode = "none"
    scratch_shapes = [pltpu.VMEM((T, P), word_table.dtype),
                      pltpu.SemaphoreType.DMA((RING,))]
    if has_pos:
        Mp = pos_table.shape[0]
        if position_ids is None:
            # Default arange positions: one contiguous (T, E) block per sequence tile.
            pos_mode = "block"
            Mp_pad = max(_round_up(Mp, T), S_pad)
            pos_tab = jnp.pad(pos_table, ((0, Mp_pad - Mp), (0, 0)))
            tensor_args.append(pos_tab)
            in_specs.append(pl.BlockSpec((T, E), lambda b, st, *_: (st, 0)))
        else:
            # Explicit position ids: per-row DMA gather sharing the ring structure.
            pos_mode = "gather"
            if position_ids.ndim == 1:
                position_ids = jnp.broadcast_to(position_ids[None, :], (B, S))
            pid = jnp.clip(position_ids.astype(jnp.int32), 0, Mp - 1)
            pos_flat = jnp.pad(pid, ((0, 0), (0, S_pad - S))).reshape(-1)
            scalar_args.append(pos_flat)
            tensor_args.append(pos_table)
            in_specs.append(pl.BlockSpec(memory_space=pl.ANY))
            scratch_shapes += [pltpu.VMEM((T, E), pos_table.dtype),
                               pltpu.SemaphoreType.DMA((RING,))]

    kernel = functools.partial(_gpt2_embed_kernel, has_proj, pos_mode, T, RING, S_pad)

    out = pl.pallas_call(
        kernel,
        out_shape=jax.ShapeDtypeStruct((B, S_pad, E), out_dtype),
        grid_spec=pltpu.PrefetchScalarGridSpec(
            num_scalar_prefetch=len(scalar_args),
            grid=(B, num_s_tiles),
            in_specs=in_specs,
            out_specs=pl.BlockSpec((None, T, E), lambda b, st, *_: (b, st, 0)),
            scratch_shapes=scratch_shapes,
        ),
        compiler_params=pltpu.CompilerParams(
            dimension_semantics=("parallel", "parallel"),
            vmem_limit_bytes=vmem_limit_bytes),
    )(*scalar_args, *tensor_args)

    return out[:, :S, :]


if __name__ == "__main__":
    # Small config exercising the word_embed_proj_dim path (gather + projection + pos add).
    B, S = 2, 8
    vocab_size = 128
    word_embed_proj_dim = 32
    embed_dim = 64
    max_position_embeddings = 16
    initializer_range = 0.02

    key = jax.random.PRNGKey(0)
    k1, k2, k3, k4, k5 = jax.random.split(key, 5)

    # Deterministic parameter init (matches reset_parameters: normal(std=0.02)).
    word_table = initializer_range * jax.random.normal(
        k1, (vocab_size, word_embed_proj_dim), jnp.float32)
    proj_weight = initializer_range * jax.random.normal(
        k2, (embed_dim, word_embed_proj_dim), jnp.float32)      # torch Linear (out, in)
    pos_table = initializer_range * jax.random.normal(
        k3, (max_position_embeddings, embed_dim), jnp.float32)
    input_ids = jax.random.randint(k4, (B, S), 0, vocab_size, jnp.int32)

    hp = jax.lax.Precision.HIGHEST
    pos_default = pos_table[jnp.arange(S)][None, :, :]

    # 1) projection + default (arange) positions
    out = jax.block_until_ready(gpt2_embeddings(input_ids, word_table, pos_table, proj_weight))
    ref = jnp.dot(word_table[input_ids], proj_weight.T, precision=hp) + pos_default
    assert out.shape == (B, S, embed_dim)
    assert jnp.allclose(out, ref, atol=1e-5), "mismatch (proj + default pos path)"

    # 2) no-projection path (word_embed_proj_dim is None)
    word_table_e = initializer_range * jax.random.normal(
        k1, (vocab_size, embed_dim), jnp.float32)
    out2 = jax.block_until_ready(gpt2_embeddings(input_ids, word_table_e, pos_table))
    ref2 = word_table_e[input_ids] + pos_default
    assert jnp.allclose(out2, ref2, atol=1e-5), "mismatch (no-proj path)"

    # 3) max_position_embeddings == 0 path (no position table)
    out3 = jax.block_until_ready(gpt2_embeddings(input_ids, word_table, None, proj_weight))
    ref3 = jnp.dot(word_table[input_ids], proj_weight.T, precision=hp)
    assert jnp.allclose(out3, ref3, atol=1e-5), "mismatch (no-pos path)"

    # 4) explicit position_ids path (per-row position gather)
    position_ids = jax.random.randint(k5, (B, S), 0, max_position_embeddings, jnp.int32)
    out4 = jax.block_until_ready(
        gpt2_embeddings(input_ids, word_table, pos_table, proj_weight,
                        position_ids=position_ids))
    ref4 = jnp.dot(word_table[input_ids], proj_weight.T, precision=hp) + pos_table[position_ids]
    assert jnp.allclose(out4, ref4, atol=1e-5), "mismatch (explicit position_ids path)"

    print("KERNEL_OK")
</pallas_src>

<mosaic_0001>
module attributes {stable_mosaic.version = 11 : i64} {
  func.func @_gpt2_embed_kernel(%arg0: i32, %arg1: i32, %arg2: memref<16xi32, #tpu.memory_space<smem>>, %arg3: memref<128x32xf32, #tpu.memory_space<any>>, %arg4: memref<32x64xf32, #tpu.memory_space<vmem>>, %arg5: memref<8x64xf32, #tpu.memory_space<vmem>>, %arg6: memref<1x8x64xf32, #tpu.memory_space<vmem>>, %arg7: memref<8x32xf32, #tpu.memory_space<vmem>>, %arg8: memref<8x!tpu.dma_semaphore, #tpu.memory_space<semaphore_mem>>) attributes {dimension_semantics = [#tpu.dimension_semantics<parallel>, #tpu.dimension_semantics<parallel>], iteration_bounds = array<i64: 2, 1>, scalar_prefetch = 1 : i64, scratch_operands = 2 : i64, tpu.core_type = #tpu.core_type<tc>, window_params = [{}, {pipeline_mode = #tpu.pipeline_mode<synchronous>, transform_indices = @transform_1, window_bounds = array<i64: 32, 64>}, {transform_indices = @transform_2, window_bounds = array<i64: 8, 64>}, {transform_indices = @transform_3, window_bounds = array<i64: 1, 8, 64>}]} {
    %c8_i32 = arith.constant 8 : i32
    %0 = arith.muli %arg0, %c8_i32 : i32
    %c8_i32_0 = arith.constant 8 : i32
    %1 = arith.muli %arg1, %c8_i32_0 : i32
    %2 = arith.addi %0, %1 : i32
    %c0_i32 = arith.constant 0 : i32
    %c8_i32_1 = arith.constant 8 : i32
    %3 = arith.addi %c0_i32, %c8_i32_1 : i32
    %c1_i32 = arith.constant 1 : i32
    scf.for %arg9 = %c0_i32 to %3 step %c1_i32  : i32 {
      %c8_i32_45 = arith.constant 8 : i32
      %c0_i32_46 = arith.constant 0 : i32
      %44 = arith.cmpi eq, %c8_i32_45, %c0_i32_46 : i32
      %c1_i32_47 = arith.constant 1 : i32
      %45 = arith.select %44, %c1_i32_47, %c8_i32_45 : i32
      %46 = arith.remsi %arg9, %45 : i32
      %c0_i32_48 = arith.constant 0 : i32
      %47 = arith.cmpi ne, %46, %c0_i32_48 : i32
      %c0_i32_49 = arith.constant 0 : i32
      %48 = arith.cmpi slt, %46, %c0_i32_49 : i32
      %c0_i32_50 = arith.constant 0 : i32
      %49 = arith.cmpi slt, %45, %c0_i32_50 : i32
      %50 = arith.xori %48, %49 : i1
      %51 = arith.andi %50, %47 : i1
      %52 = arith.addi %46, %45 : i32
      %53 = arith.select %51, %52, %46 : i32
      %c8_i32_51 = arith.constant 8 : i32
      %54 = arith.cmpi sge, %arg9, %c8_i32_51 : i32
      %55 = arith.extui %54 : i1 to i32
      %c0_i32_52 = arith.constant 0 : i32
      %56 = arith.cmpi ne, %55, %c0_i32_52 : i32
      scf.if %56 {
        %c8_i32_55 = arith.constant 8 : i32
        %64 = arith.subi %arg9, %c8_i32_55 : i32
        %c0_i32_56 = arith.constant 0 : i32
        %c0_i32_57 = arith.constant 0 : i32
        %65 = tpu.memref_slice %arg3[%c0_i32_56, %c0_i32_57] : memref<128x32xf32, #tpu.memory_space<any>> -> memref<1x32xf32, #tpu.memory_space<any>>
        %c0_i32_58 = arith.constant 0 : i32
        %66 = tpu.memref_slice %arg7[%64, %c0_i32_58] : memref<8x32xf32, #tpu.memory_space<vmem>> -> memref<1x32xf32, #tpu.memory_space<vmem>>
        %67 = tpu.memref_slice %arg8[%53] : memref<8x!tpu.dma_semaphore, #tpu.memory_space<semaphore_mem>> -> memref<1x!tpu.dma_semaphore, #tpu.memory_space<semaphore_mem>>
        %68 = tpu.memref_squeeze %67 : memref<1x!tpu.dma_semaphore, #tpu.memory_space<semaphore_mem>> -> memref<!tpu.dma_semaphore, #tpu.memory_space<semaphore_mem>>
        tpu.wait_dma2 semaphore(%68 : memref<!tpu.dma_semaphore, #tpu.memory_space<semaphore_mem>>) src(%65 : memref<1x32xf32, #tpu.memory_space<any>>) dst(%66 : memref<1x32xf32, #tpu.memory_space<vmem>>)
      } else {
      }
      %57 = arith.addi %2, %arg9 : i32
      %58 = arith.index_cast %57 : i32 to index
      %59 = memref.load %arg2[%58] : memref<16xi32, #tpu.memory_space<smem>>
      %c0_i32_53 = arith.constant 0 : i32
      %60 = tpu.memref_slice %arg3[%59, %c0_i32_53] : memref<128x32xf32, #tpu.memory_space<any>> -> memref<1x32xf32, #tpu.memory_space<any>>
      %c0_i32_54 = arith.constant 0 : i32
      %61 = tpu.memref_slice %arg7[%arg9, %c0_i32_54] : memref<8x32xf32, #tpu.memory_space<vmem>> -> memref<1x32xf32, #tpu.memory_space<vmem>>
      %62 = tpu.memref_slice %arg8[%53] : memref<8x!tpu.dma_semaphore, #tpu.memory_space<semaphore_mem>> -> memref<1x!tpu.dma_semaphore, #tpu.memory_space<semaphore_mem>>
      %63 = tpu.memref_squeeze %62 : memref<1x!tpu.dma_semaphore, #tpu.memory_space<semaphore_mem>> -> memref<!tpu.dma_semaphore, #tpu.memory_space<semaphore_mem>>
      tpu.enqueue_dma source(%60 : memref<1x32xf32, #tpu.memory_space<any>>) target(%61 : memref<1x32xf32, #tpu.memory_space<vmem>>) target_semaphore(%63 : memref<!tpu.dma_semaphore, #tpu.memory_space<semaphore_mem>>)
    }
    %c8_i32_2 = arith.constant 8 : i32
    %c0_i32_3 = arith.constant 0 : i32
    %c0_i32_4 = arith.constant 0 : i32
    %c0_i32_5 = arith.constant 0 : i32
    %4 = tpu.memref_slice %arg3[%c0_i32_4, %c0_i32_5] : memref<128x32xf32, #tpu.memory_space<any>> -> memref<1x32xf32, #tpu.memory_space<any>>
    %c0_i32_6 = arith.constant 0 : i32
    %c0_i32_7 = arith.constant 0 : i32
    %5 = tpu.memref_slice %arg7[%c0_i32_6, %c0_i32_7] : memref<8x32xf32, #tpu.memory_space<vmem>> -> memref<1x32xf32, #tpu.memory_space<vmem>>
    %6 = tpu.memref_slice %arg8[%c0_i32_3] : memref<8x!tpu.dma_semaphore, #tpu.memory_space<semaphore_mem>> -> memref<1x!tpu.dma_semaphore, #tpu.memory_space<semaphore_mem>>
    %7 = tpu.memref_squeeze %6 : memref<1x!tpu.dma_semaphore, #tpu.memory_space<semaphore_mem>> -> memref<!tpu.dma_semaphore, #tpu.memory_space<semaphore_mem>>
    tpu.wait_dma2 semaphore(%7 : memref<!tpu.dma_semaphore, #tpu.memory_space<semaphore_mem>>) src(%4 : memref<1x32xf32, #tpu.memory_space<any>>) dst(%5 : memref<1x32xf32, #tpu.memory_space<vmem>>)
    %c1_i32_8 = arith.constant 1 : i32
    %c0_i32_9 = arith.constant 0 : i32
    %c0_i32_10 = arith.constant 0 : i32
    %8 = tpu.memref_slice %arg3[%c0_i32_9, %c0_i32_10] : memref<128x32xf32, #tpu.memory_space<any>> -> memref<1x32xf32, #tpu.memory_space<any>>
    %c1_i32_11 = arith.constant 1 : i32
    %c0_i32_12 = arith.constant 0 : i32
    %9 = tpu.memref_slice %arg7[%c1_i32_11, %c0_i32_12] : memref<8x32xf32, #tpu.memory_space<vmem>> -> memref<1x32xf32, #tpu.memory_space<vmem>>
    %10 = tpu.memref_slice %arg8[%c1_i32_8] : memref<8x!tpu.dma_semaphore, #tpu.memory_space<semaphore_mem>> -> memref<1x!tpu.dma_semaphore, #tpu.memory_space<semaphore_mem>>
    %11 = tpu.memref_squeeze %10 : memref<1x!tpu.dma_semaphore, #tpu.memory_space<semaphore_mem>> -> memref<!tpu.dma_semaphore, #tpu.memory_space<semaphore_mem>>
    tpu.wait_dma2 semaphore(%11 : memref<!tpu.dma_semaphore, #tpu.memory_space<semaphore_mem>>) src(%8 : memref<1x32xf32, #tpu.memory_space<any>>) dst(%9 : memref<1x32xf32, #tpu.memory_space<vmem>>)
    %c2_i32 = arith.constant 2 : i32
    %c0_i32_13 = arith.constant 0 : i32
    %c0_i32_14 = arith.constant 0 : i32
    %12 = tpu.memref_slice %arg3[%c0_i32_13, %c0_i32_14] : memref<128x32xf32, #tpu.memory_space<any>> -> memref<1x32xf32, #tpu.memory_space<any>>
    %c2_i32_15 = arith.constant 2 : i32
    %c0_i32_16 = arith.constant 0 : i32
    %13 = tpu.memref_slice %arg7[%c2_i32_15, %c0_i32_16] : memref<8x32xf32, #tpu.memory_space<vmem>> -> memref<1x32xf32, #tpu.memory_space<vmem>>
    %14 = tpu.memref_slice %arg8[%c2_i32] : memref<8x!tpu.dma_semaphore, #tpu.memory_space<semaphore_mem>> -> memref<1x!tpu.dma_semaphore, #tpu.memory_space<semaphore_mem>>
    %15 = tpu.memref_squeeze %14 : memref<1x!tpu.dma_semaphore, #tpu.memory_space<semaphore_mem>> -> memref<!tpu.dma_semaphore, #tpu.memory_space<semaphore_mem>>
    tpu.wait_dma2 semaphore(%15 : memref<!tpu.dma_semaphore, #tpu.memory_space<semaphore_mem>>) src(%12 : memref<1x32xf32, #tpu.memory_space<any>>) dst(%13 : memref<1x32xf32, #tpu.memory_space<vmem>>)
    %c3_i32 = arith.constant 3 : i32
    %c0_i32_17 = arith.constant 0 : i32
    %c0_i32_18 = arith.constant 0 : i32
    %16 = tpu.memref_slice %arg3[%c0_i32_17, %c0_i32_18] : memref<128x32xf32, #tpu.memory_space<any>> -> memref<1x32xf32, #tpu.memory_space<any>>
    %c3_i32_19 = arith.constant 3 : i32
    %c0_i32_20 = arith.constant 0 : i32
    %17 = tpu.memref_slice %arg7[%c3_i32_19, %c0_i32_20] : memref<8x32xf32, #tpu.memory_space<vmem>> -> memref<1x32xf32, #tpu.memory_space<vmem>>
    %18 = tpu.memref_slice %arg8[%c3_i32] : memref<8x!tpu.dma_semaphore, #tpu.memory_space<semaphore_mem>> -> memref<1x!tpu.dma_semaphore, #tpu.memory_space<semaphore_mem>>
    %19 = tpu.memref_squeeze %18 : memref<1x!tpu.dma_semaphore, #tpu.memory_space<semaphore_mem>> -> memref<!tpu.dma_semaphore, #tpu.memory_space<semaphore_mem>>
    tpu.wait_dma2 semaphore(%19 : memref<!tpu.dma_semaphore, #tpu.memory_space<semaphore_mem>>) src(%16 : memref<1x32xf32, #tpu.memory_space<any>>) dst(%17 : memref<1x32xf32, #tpu.memory_space<vmem>>)
    %c4_i32 = arith.constant 4 : i32
    %c0_i32_21 = arith.constant 0 : i32
    %c0_i32_22 = arith.constant 0 : i32
    %20 = tpu.memref_slice %arg3[%c0_i32_21, %c0_i32_22] : memref<128x32xf32, #tpu.memory_space<any>> -> memref<1x32xf32, #tpu.memory_space<any>>
    %c4_i32_23 = arith.constant 4 : i32
    %c0_i32_24 = arith.constant 0 : i32
    %21 = tpu.memref_slice %arg7[%c4_i32_23, %c0_i32_24] : memref<8x32xf32, #tpu.memory_space<vmem>> -> memref<1x32xf32, #tpu.memory_space<vmem>>
    %22 = tpu.memref_slice %arg8[%c4_i32] : memref<8x!tpu.dma_semaphore, #tpu.memory_space<semaphore_mem>> -> memref<1x!tpu.dma_semaphore, #tpu.memory_space<semaphore_mem>>
    %23 = tpu.memref_squeeze %22 : memref<1x!tpu.dma_semaphore, #tpu.memory_space<semaphore_mem>> -> memref<!tpu.dma_semaphore, #tpu.memory_space<semaphore_mem>>
    tpu.wait_dma2 semaphore(%23 : memref<!tpu.dma_semaphore, #tpu.memory_space<semaphore_mem>>) src(%20 : memref<1x32xf32, #tpu.memory_space<any>>) dst(%21 : memref<1x32xf32, #tpu.memory_space<vmem>>)
    %c5_i32 = arith.constant 5 : i32
    %c0_i32_25 = arith.constant 0 : i32
    %c0_i32_26 = arith.constant 0 : i32
    %24 = tpu.memref_slice %arg3[%c0_i32_25, %c0_i32_26] : memref<128x32xf32, #tpu.memory_space<any>> -> memref<1x32xf32, #tpu.memory_space<any>>
    %c5_i32_27 = arith.constant 5 : i32
    %c0_i32_28 = arith.constant 0 : i32
    %25 = tpu.memref_slice %arg7[%c5_i32_27, %c0_i32_28] : memref<8x32xf32, #tpu.memory_space<vmem>> -> memref<1x32xf32, #tpu.memory_space<vmem>>
    %26 = tpu.memref_slice %arg8[%c5_i32] : memref<8x!tpu.dma_semaphore, #tpu.memory_space<semaphore_mem>> -> memref<1x!tpu.dma_semaphore, #tpu.memory_space<semaphore_mem>>
    %27 = tpu.memref_squeeze %26 : memref<1x!tpu.dma_semaphore, #tpu.memory_space<semaphore_mem>> -> memref<!tpu.dma_semaphore, #tpu.memory_space<semaphore_mem>>
    tpu.wait_dma2 semaphore(%27 : memref<!tpu.dma_semaphore, #tpu.memory_space<semaphore_mem>>) src(%24 : memref<1x32xf32, #tpu.memory_space<any>>) dst(%25 : memref<1x32xf32, #tpu.memory_space<vmem>>)
    %c6_i32 = arith.constant 6 : i32
    %c0_i32_29 = arith.constant 0 : i32
    %c0_i32_30 = arith.constant 0 : i32
    %28 = tpu.memref_slice %arg3[%c0_i32_29, %c0_i32_30] : memref<128x32xf32, #tpu.memory_space<any>> -> memref<1x32xf32, #tpu.memory_space<any>>
    %c6_i32_31 = arith.constant 6 : i32
    %c0_i32_32 = arith.constant 0 : i32
    %29 = tpu.memref_slice %arg7[%c6_i32_31, %c0_i32_32] : memref<8x32xf32, #tpu.memory_space<vmem>> -> memref<1x32xf32, #tpu.memory_space<vmem>>
    %30 = tpu.memref_slice %arg8[%c6_i32] : memref<8x!tpu.dma_semaphore, #tpu.memory_space<semaphore_mem>> -> memref<1x!tpu.dma_semaphore, #tpu.memory_space<semaphore_mem>>
    %31 = tpu.memref_squeeze %30 : memref<1x!tpu.dma_semaphore, #tpu.memory_space<semaphore_mem>> -> memref<!tpu.dma_semaphore, #tpu.memory_space<semaphore_mem>>
    tpu.wait_dma2 semaphore(%31 : memref<!tpu.dma_semaphore, #tpu.memory_space<semaphore_mem>>) src(%28 : memref<1x32xf32, #tpu.memory_space<any>>) dst(%29 : memref<1x32xf32, #tpu.memory_space<vmem>>)
    %c7_i32 = arith.constant 7 : i32
    %c0_i32_33 = arith.constant 0 : i32
    %c0_i32_34 = arith.constant 0 : i32
    %32 = tpu.memref_slice %arg3[%c0_i32_33, %c0_i32_34] : memref<128x32xf32, #tpu.memory_space<any>> -> memref<1x32xf32, #tpu.memory_space<any>>
    %c7_i32_35 = arith.constant 7 : i32
    %c0_i32_36 = arith.constant 0 : i32
    %33 = tpu.memref_slice %arg7[%c7_i32_35, %c0_i32_36] : memref<8x32xf32, #tpu.memory_space<vmem>> -> memref<1x32xf32, #tpu.memory_space<vmem>>
    %34 = tpu.memref_slice %arg8[%c7_i32] : memref<8x!tpu.dma_semaphore, #tpu.memory_space<semaphore_mem>> -> memref<1x!tpu.dma_semaphore, #tpu.memory_space<semaphore_mem>>
    %35 = tpu.memref_squeeze %34 : memref<1x!tpu.dma_semaphore, #tpu.memory_space<semaphore_mem>> -> memref<!tpu.dma_semaphore, #tpu.memory_space<semaphore_mem>>
    tpu.wait_dma2 semaphore(%35 : memref<!tpu.dma_semaphore, #tpu.memory_space<semaphore_mem>>) src(%32 : memref<1x32xf32, #tpu.memory_space<any>>) dst(%33 : memref<1x32xf32, #tpu.memory_space<vmem>>)
    %c0 = arith.constant 0 : index
    %c0_37 = arith.constant 0 : index
    %36 = vector.load %arg7[%c0, %c0_37] : memref<8x32xf32, #tpu.memory_space<vmem>>, vector<8x32xf32>
    %c0_38 = arith.constant 0 : index
    %c0_39 = arith.constant 0 : index
    %37 = vector.load %arg4[%c0_38, %c0_39] : memref<32x64xf32, #tpu.memory_space<vmem>>, vector<32x64xf32>
    %cst = arith.constant dense<0.000000e+00> : vector<8x64xf32>
    %38 = tpu.matmul %36, %37, %cst {dimension_numbers = #tpu.dot_dimension_numbers<[1], [0], [0], [1], [0, 0, 1, 1], [], []>} : vector<8x32xf32>, vector<32x64xf32>, vector<8x64xf32> -> vector<8x64xf32>
    %c0_40 = arith.constant 0 : index
    %c0_41 = arith.constant 0 : index
    %39 = vector.load %arg5[%c0_40, %c0_41] : memref<8x64xf32, #tpu.memory_space<vmem>>, vector<8x64xf32>
    %40 = arith.addf %38, %39 : vector<8x64xf32>
    %c0_42 = arith.constant 0 : index
    %c0_43 = arith.constant 0 : index
    %c0_44 = arith.constant 0 : index
    %41 = vector.load %arg6[%c0_42, %c0_43, %c0_44] : memref<1x8x64xf32, #tpu.memory_space<vmem>>, vector<1x8x64xf32>
    %42 = vector.shape_cast %41 : vector<1x8x64xf32> to vector<8x64xf32>
    %43 = vector.shape_cast %40 : vector<8x64xf32> to vector<1x8x64xf32>
    tpu.vector_store %arg6[%c0_42, %c0_43, %c0_44], %43 {strides = array<i32>} : memref<1x8x64xf32, #tpu.memory_space<vmem>>, vector<1x8x64xf32>,
    return
  }
  func.func @transform_1(%arg0: i32, %arg1: i32, %arg2: memref<16xi32, #tpu.memory_space<smem>>) -> (i32, i32) {
    %c0_i32 = arith.constant 0 : i32
    %c0_i32_0 = arith.constant 0 : i32
    %c0_i32_1 = arith.constant 0 : i32
    return %c0_i32, %c0_i32_0 : i32, i32
  }
  func.func @transform_2(%arg0: i32, %arg1: i32, %arg2: memref<16xi32, #tpu.memory_space<smem>>) -> (i32, i32) {
    %c0_i32 = arith.constant 0 : i32
    %c0_i32_0 = arith.constant 0 : i32
    return %arg1, %c0_i32 : i32, i32
  }
  func.func @transform_3(%arg0: i32, %arg1: i32, %arg2: memref<16xi32, #tpu.memory_space<smem>>) -> (i32, i32, i32) {
    %c0_i32 = arith.constant 0 : i32
    %c0_i32_0 = arith.constant 0 : i32
    return %arg0, %arg1, %c0_i32 : i32, i32, i32
  }
}

</mosaic_0001>

<bundles_post_ra>
// kernel: tpu_custom_call.1
= control target key start
LH: loop header
LB: loop body
LE: loop exit
PB: predicated region body
PF: predicated region fallthrough
CT: control target
= control target key end

     0   :  { %s900_s0 = inlined_call_operand.vmem [shape: s32[16], index: 0, kind: input, shape index: {}]   ;;  %s901_s1 = inlined_call_operand.vmem [shape: f32[128,32], index: 1, kind: input, shape index: {}]   ;;  %s902_s2 = inlined_call_operand.vmem [shape: f32[32,64], index: 2, kind: input, shape index: {}]   ;;  %s903_s3 = inlined_call_operand.vmem [shape: f32[16,64], index: 3, kind: input, shape index: {}]   ;;  %s904_s4 = inlined_call_operand.hbm [shape: f32[2,8,64], index: 4, kind: output, shape index: {}]  }
   0x1   :  { %s9_s17 = sshll.u32 %s900_s0, 4  ;;  %s10_s17 = int_to_ptr.vmem [resolvable:$true] %s9_s17 }
   0x2   :  { %s616_s18 = scalar_lea.vmem %s10_s17, 16  ;;  %p621_p1 = scmp.lt.s32.totalorder %s10_s17, %s10_s17 }
   0x3   :  { %p617_p0 = scmp.ne.s32.totalorder %s10_s17, %s616_s18  ;;  %p622_p2 = scmp.lt.s32.totalorder %s616_s18, %s616_s18 }
   0x5   :  { %p623_p3 = por %p622_p2, %p621_p1 }
   0x7   :  { %p624_p4 = pnand %p623_p3, %p617_p0 }
   0x9   :  { %627 = shalt.err (!%p624_p4)  }
   0xa   :  { %s736_s19 = smov [#allocation5]  }
   0xb   :  { %12 = dma.vmem_to_smem %s10_s17, 16, %s736_s19, [#allocation4] }
   0xc   :  { %682 = dma.done.wait [#allocation4], 16 }
   0xd   :  { %683 = vsyncadd [#allocation4], 4294967280 }
   0xe   :  { %14 = sfence }
   0xf   :  { %15 = vsyncpa [#allocation7], 0 }
  0x10   :  { %17 = vsyncpa [#allocation7 + $0x1], 0  ;;  %s768_s20 = smov 0   ;;  %s770_s21 = smov 0  }
  0x11   :  { %s772_s0 = smov 0   ;;  %s774_s22 = smov 0  }
  0x12   :  { %s776_s23 = smov 0   ;;  %s778_s24 = smov 0  }
  0x13 LB: > { %s507_s25 = sadd.s32 4294967295, %s730_s24   ;;  %s508_s26 = sadd.s32 4294967294, %s730_s24   ;;  %s730_s24 = sphi %s778_s24, %s23_s24   ;;  %s726_s23 = sphi %s776_s23, %s911_s23   ;;  %s722_s22 = sphi %s774_s22, %s910_s22   ;;  %s718_s0 = sphi %s772_s0, %s909_s0   ;;  %s714_s21 = sphi %s770_s21, %s908_s21   ;;  %s710_s20 = sphi %s768_s20, %s907_s20  }
  0x14   : > { %s35_s27 = sadd.s32 1, %s726_s23  ;;  %s91_s28 = sadd.s32 1, %s718_s0 }
  0x15   : > { %p37_p5 = scmp.ge.s32.totalorder %s35_s27, 2  ;;  %p101_p6 = scmp.ne.s32.totalorder %s718_s0, %s714_s21 }
  0x16   : > { %p102_p7 = scmp.eq.s32.totalorder %s507_s25, 1  ;;  %p107_p8 = scmp.ne.s32.totalorder %s714_s21, %s710_s20 }
  0x17   : > { %s913_s27 = smov (%p37_p5, %s35_s27), 0  ;;  %p108_p10 = scmp.eq.s32.totalorder %s508_s26, 1 }
  0x18   : > { %p808_p9 = por %p102_p7, %p101_p6  ;;  %s86_s30 = ssub.s32 %s726_s23, %s913_s27 }
  0x19   : > { %p511_p11 = scmp.ge.s32.totalorder %s730_s24, 1  ;;  %p89_p12 = scmp.eq.s32.totalorder %s86_s30, 0 }
  0x1a   : > { %p815_p13 = por %p108_p10, %p107_p8  ;;  %p136_p0 = scmp.lt.s32.totalorder %s730_s24, 3 }
  0x1b   : > { %s821_s6 = scalar_select %p89_p12, %s718_s0, %s91_s28  }
  0x1c   : > { %p137_p1 = pnand %p511_p11, %p136_p0 }
  0x1d   : > { %s154_s7 = sand.u32 (!%p137_p1), 1, %s714_s21   ;;  %s513_s8 = sshll.u32 (!%p137_p1), %s722_s22, 3 }
  0x1e   : > { %140 = sbr.rel (%p137_p1) target bundleno = 295 (0x127), region = 28  ;;  %s827_s9 = sshll.u32 (!%p137_p1), %s154_s7, 3 }
  0x1f   : > { %s156_s10 = scalar_lea.vmem (!%p137_p1), [#allocation6], %s827_s9  ;;  %s732_s11 = smov (!%p137_p1), 0  }
  0x23 LB: >> { %p170_p2 = scmp.lt.s32.totalorder %s734_s11, 0  ;;  %s171_s12 = ssub.s32 0, %s734_s11  ;;  %s734_s11 = sphi %s732_s11, %s169_s11  }
  0x24   : >> { %s514_s13 = smin.u32 %s734_s11, %s171_s12  ;;  %p555_p3 = scmp.ge.s32.totalorder %s734_s11, 8 }
  0x25   : >> { %s173_s14 = sand.u32 7, %s514_s13  }
  0x26   : >> { %s174_s15 = ssub.s32 0, %s173_s14 }
  0x27   : >> { %s915_s15 = smov (!%p170_p2, %s174_s15), %s173_s14 }
  0x28   : >> { %p516_p4 = scmp.lt.s32.totalorder %s915_s15, 0  ;;  %s180_s16 = sadd.s32 8, %s915_s15 }
  0x2a   : >> { %s917_s16 = smov (!%p516_p4, %s180_s16), %s915_s15 }
  0x2b   : >> { %s186_s17 = scalar_lea.sflag [#allocation3], %s917_s16 }
  0x2c   : >> { %685 = dma.done.wait (%p555_p3), %s186_s17, 16 }
  0x2d   : >> { %687 = vsyncadd (%p555_p3), %s186_s17, 4294967280  ;;  %s190_s18 = sadd.s32 %s734_s11, %s513_s8  ;;  %s193_s30 = scalar_lea.vmem [#allocation2], %s734_s11 }
  0x2e   : >> { %s191_s19 = sld [smem:[#allocation5 + %s190_s18]] }
  0x34   : >> { %s192_s28 = scalar_lea.vmem %s901_s1, %s191_s19 }
  0x35   : >> { %v213_v0 = vld [vmem:[%s192_s28] sm:$0x1] }
  0x36   : >> { %214 = vst [vmem:[%s193_s30] sm:$0x1] %v213_v0 }
  0x37   : >> { %240 = vsyncadd %s186_s17, 16  ;;  %s169_s11 = sadd.s32 1, %s734_s11  }
  0x38   : >> { %p166_p5 = scmp.ge.s32.totalorder %s169_s11, 8  }
  0x3a   : > { %168 = sbr.rel (!%p166_p5) target bundleno = 35 (0x23), region = 132 }
  0x3f   : > { %688 = dma.done.wait [#allocation3], 16 }
  0x40   : > { %689 = vsyncadd [#allocation3], 4294967280 }
  0x41   : > { %690 = dma.done.wait [#allocation3 + $0x1], 16 }
  0x42   : > { %691 = vsyncadd [#allocation3 + $0x1], 4294967280 }
  0x43   : > { %692 = dma.done.wait [#allocation3 + $0x2], 16 }
  0x44   : > { %693 = vsyncadd [#allocation3 + $0x2], 4294967280 }
  0x45   : > { %694 = dma.done.wait [#allocation3 + $0x3], 16 }
  0x46   : > { %695 = vsyncadd [#allocation3 + $0x3], 4294967280 }
  0x47   : > { %696 = dma.done.wait [#allocation3 + $0x4], 16 }
  0x48   : > { %697 = vsyncadd [#allocation3 + $0x4], 4294967280 }
  0x49   : > { %698 = dma.done.wait [#allocation3 + $0x5], 16 }
  0x4a   : > { %699 = vsyncadd [#allocation3 + $0x5], 4294967280 }
  0x4b   : > { %700 = dma.done.wait [#allocation3 + $0x6], 16 }
  0x4c   : > { %701 = vsyncadd [#allocation3 + $0x6], 4294967280 }
  0x4d   : > { %702 = dma.done.wait [#allocation3 + $0x7], 16 }
  0x4e   : > { %703 = vsyncadd [#allocation3 + $0x7], 4294967280  ;;  %v737_v1 = vmov 0.0   ;;  %vm738_vm0 = vmmov 0   ;;  %v269_v2 = vld [vmem:[%s902_s2 + $0x18] sm:$0xff]  ;;  %v268_v3 = vld [vmem:[%s902_s2 + $0x10] sm:$0xff] }
  0x4f   : > { %536 = vmatprep.subr.mxu0 %v737_v1  ;;  %544 = vmatprep.mubr.msk.f32.mxu0 %vm738_vm0, %v737_v1  ;;  %v267_v4 = vld [vmem:[%s902_s2 + $0x8] sm:$0xff]  ;;  %v266_v5 = vld [vmem:[%s902_s2] sm:$0xff]  ;;  %vm271_vm1 = vcmask 261120   ;;  %s520_s25 = sshll.u32 %s722_s22, 7  ;;  %s362_s26 = sshll.u32 %s156_s10, 4  ;;  %vm345_vm2 = vcmask 523264   ;;  %s363_s26 = int_to_ptr.vmem [resolvable:$true] %s362_s26 }
  0x50   : > { %537 = vmatpush3.msra.mxu0 %v269_v2  ;;  %v265_v6 = vld [vmem:[#allocation2] sm:$0xff]  ;;  %s856_s8 = scalar_lea.hbm %s904_s4, %s520_s25  ;;  %s348_s11 = scalar_lea.sflag [#allocation7], %s154_s7 }
  0x51   : > { %538 = vmatprep.subr.mxu0 %v737_v1  ;;  %v270_v7 = vld [vmem:[%s903_s3] sm:$0xff]  ;;  %s628_s12 = scalar_lea.vmem %s363_s26, 128  ;;  %s739_s22 = smov [#allocation6]  }
  0x52   : > { %539 = vmatpush3.msra.mxu0 %v268_v3  ;;  %p629_p6 = scmp.ne.s32.totalorder %s363_s26, %s628_s12  ;;  %s632_s13 = sshll.u32 %s739_s22, 4  ;;  %s633_s13 = int_to_ptr.vmem [resolvable:$false] %s632_s13 }
  0x53   : > { %540 = vmatprep.subr.mxu0 %v737_v1  ;;  %s634_s14 = scalar_lea.vmem %s633_s13, 256  ;;  %p635_p10 = scmp.lt.s32.totalorder %s363_s26, %s633_s13 }
  0x54   : > { %541 = vmatpush3.msra.mxu0 %v267_v4  ;;  %p630_p7 = pnand %p629_p6, %p808_p9  ;;  %p636_p11 = scmp.lt.s32.totalorder %s634_s14, %s628_s12 }
  0x55   : > { %542 = vmatprep.subr.mxu0 %v737_v1 }
  0x56   : > { %543 = vmatpush3.msra.mxu0 %v266_v5  ;;  %p631_p8 = pneg %p630_p7  ;;  %p637_p12 = por %p636_p11, %p635_p10 }
  0x57   : > { %545 = vmatmul.mubr.msk.f32.vlgmr.msra.gmra.mxu0 %vm271_vm1, %v265_v6 }
  0x58   : > { %p638_p0 = pnand %p637_p12, %p631_p8 }
 0x117   : > { %v341_v8 = vpop.f32.mrf.mxu0 }
 0x118   : > { %v342_v9 = vadd.f32 %v341_v8, %v270_v7 }
 0x119   : > { %v546_v10 = vpop.f32.mrf.mxu0 }
 0x11a   : > { %346 = vst.msk [vmem:[%s156_s10] sm:$0xff] %vm345_vm2, %v342_v9 }
 0x11b   : > { %641 = shalt.err (!%p638_p0)
}
 0x11c   : > { %s642_s9 = scalar_lea.hbm %s856_s8, 128  ;;  %s646_s15 = scalar_lea.hbm %s904_s4, 256 }
 0x11d   : > { %p643_p1 = scmp.ne.s32.totalorder %s856_s8, %s642_s9  ;;  %p647_p4 = scmp.lt.s32.totalorder %s856_s8, %s904_s4 }
 0x11e   : > { %p648_p5 = scmp.lt.s32.totalorder %s646_s15, %s642_s9 }
 0x11f   : > { %p644_p2 = pnand %p643_p1, %p808_p9 }
 0x120   : > { %p649_p6 = por %p648_p5, %p647_p4 }
 0x121   : > { %p645_p3 = pneg %p644_p2 }
 0x123   : > { %p650_p7 = pnand %p649_p6, %p645_p3 }
 0x125   : > { %653 = shalt.err (!%p650_p7)
}
 0x126   : > { %549 = dma.vmem_to_hbm [thread:$0]  (%p808_p9), %s363_s26, 128, %s856_s8, %s348_s11  }
 0x127 PF: > { %p556_p8 = scmp.ge.s32.totalorder %s730_s24, 2  ;;  %s374_s18 = sand.u32 1, %s710_s20  }
 0x128   : > { %s375_s19 = scalar_lea.sflag [#allocation7], %s374_s18 }
 0x129   : > { %p552_p10 = pnand %p556_p8, %p815_p13 }
 0x12b   : > { %p553_p11 = pneg %p552_p10 }
 0x12d   : > { %705 = dma.done.wait (%p553_p11), %s375_s19, 128  }
 0x12e   : > { %707 = vsyncadd (%p553_p11), %s375_s19, 4294967168  ;;  %s23_s24 = sadd.s32 1, %s730_s24   ;;  %s907_s20 = smov %s714_s21 }
 0x12f   : > { %p20_p12 = scmp.ge.s32.totalorder %s23_s24, 4   ;;  %s908_s21 = smov %s718_s0 }
 0x130   : > { %s909_s0 = smov %s821_s6  ;;  %s910_s22 = smov %s726_s23 }
 0x131   : > { %s911_s23 = smov %s913_s27  ;;  %22 = sbr.rel (!%p20_p12) target bundleno = 19 (0x13), region = 143 }
 0x136   :  { %380 = vsyncpa [#allocation7], 1 }
 0x137   :  { %382 = vsyncpa [#allocation7 + $0x1], 1 }
 0x138   :  { %383 = vsyncmov [#allocation3] }
 0x13b   :  { %s384_s29 = vpop.sfrf %383 }
 0x13c   :  { %p523_p9 = scmp.ne.s32.totalorder %s384_s29, 0 }
 0x13e   :  { %388 = shalt.err (%p523_p9)  }
 0x13f   :  { %390 = vsyncmov [#allocation3 + $0x1] }
 0x142   :  { %s391_s5 = vpop.sfrf %390 }
 0x143   :  { %p524_p13 = scmp.ne.s32.totalorder %s391_s5, 0 }
 0x145   :  { %395 = shalt.err (%p524_p13)  }
 0x146   :  { %397 = vsyncmov [#allocation3 + $0x2] }
 0x149   :  { %s398_s25 = vpop.sfrf %397 }
 0x14a   :  { %p525_p0 = scmp.ne.s32.totalorder %s398_s25, 0 }
 0x14c   :  { %402 = shalt.err (%p525_p0)  }
 0x14d   :  { %404 = vsyncmov [#allocation3 + $0x3] }
 0x150   :  { %s405_s6 = vpop.sfrf %404 }
 0x151   :  { %p526_p1 = scmp.ne.s32.totalorder %s405_s6, 0 }
 0x153   :  { %409 = shalt.err (%p526_p1)  }
 0x154   :  { %411 = vsyncmov [#allocation3 + $0x4] }
 0x157   :  { %s412_s24 = vpop.sfrf %411 }
 0x158   :  { %p527_p2 = scmp.ne.s32.totalorder %s412_s24, 0 }
 0x15a   :  { %416 = shalt.err (%p527_p2)  }
 0x15b   :  { %418 = vsyncmov [#allocation3 + $0x5] }
 0x15e   :  { %s419_s1 = vpop.sfrf %418 }
 0x15f   :  { %p528_p3 = scmp.ne.s32.totalorder %s419_s1, 0 }
 0x161   :  { %423 = shalt.err (%p528_p3)  }
 0x162   :  { %425 = vsyncmov [#allocation3 + $0x6] }
 0x165   :  { %s426_s2 = vpop.sfrf %425 }
 0x166   :  { %p529_p4 = scmp.ne.s32.totalorder %s426_s2, 0 }
 0x168   :  { %430 = shalt.err (%p529_p4)  }
 0x169   :  { %432 = vsyncmov [#allocation3 + $0x7] }
 0x16c   :  { %s433_s3 = vpop.sfrf %432 }
 0x16d   :  { %p530_p5 = scmp.ne.s32.totalorder %s433_s3, 0 }
 0x16f   :  { %437 = shalt.err (%p530_p5)  }

</bundles_post_ra>
